<compile_context>
chip_gen: v6e
topology: v6e:2x2x1
jax: 0.10.0
libtpu: 0.0.40
codegen_flags: <defaults>
</compile_context>

<pallas_src>
import functools

import jax
import jax.numpy as jnp
from jax.experimental import pallas as pl
from jax.experimental.pallas import tpu as pltpu


def _round_up(n, m):
    return ((n + m - 1) // m) * m


def _mlp_kernel(out_dims, x_ref, *refs):
    """Fused 6-layer MLP on one (TM, Kp) batch tile.

    refs = (w1, ..., w6, bias_slab, out). Weights and the bias slab have constant
    index_maps, so they are loaded once and stay resident in VMEM across batch tiles;
    only the x / out tiles stream with the grid.
    """
    o_ref = refs[-1]
    b_ref = refs[-2]
    w_refs = refs[:-2]
    n_layers = len(w_refs)

    b_all = b_ref[...]                       # (n_layers, Fmax) float32 bias slab
    h = x_ref[...]                           # (TM, Kp) bf16 activations
    for l in range(n_layers):
        d = out_dims[l]
        # bf16 operands -> MXU, f32 accumulation.
        y = jnp.dot(h, w_refs[l][...], preferred_element_type=jnp.float32)
        y = y + b_all[l:l + 1, :d]           # bias broadcast over the batch tile (f32)
        if l < n_layers - 1:
            h = jnp.maximum(y, 0.0).astype(jnp.bfloat16)   # ReLU in f32, recast for next MXU pass
        else:
            o_ref[...] = y.astype(o_ref.dtype)             # final layer: no ReLU


def mlp_forward(x, params):
    """x: (B, input_size) float32. params: list of (W_t, b) with W_t stored as (in, out)."""
    B, K = x.shape
    num_classes = params[-1][0].shape[1]

    # ---- lane-dense padding: every feature dim -> multiple of 128 (zero padded) ----
    Kp = _round_up(K, 128)
    padded_w = []
    out_dims = []
    for (w_t, b) in params:
        fi, fo = w_t.shape
        fip, fop = _round_up(fi, 128), _round_up(fo, 128)
        wp = jnp.pad(w_t, ((0, fip - fi), (0, fop - fo))).astype(jnp.bfloat16)
        padded_w.append(wp)
        out_dims.append(fop)
    Fmax = max(out_dims)
    Cp = out_dims[-1]
    # All biases packed into one contiguous slab -> a single small DMA instead of six.
    b_slab = jnp.stack(
        [jnp.pad(b, (0, Fmax - b.shape[0])).astype(jnp.float32) for (_, b) in params]
    )  # (6, Fmax)

    # ---- batch tiling: MXU-sized tiles when B is large, one small tile otherwise ----
    TM = 128 if B >= 128 else _round_up(max(B, 8), 8)
    Bp = _round_up(B, TM)
    xp = jnp.pad(x, ((0, Bp - B), (0, Kp - K))).astype(jnp.bfloat16)

    grid = (Bp // TM,)
    in_specs = [pl.BlockSpec((TM, Kp), lambda i: (i, 0))]                 # streamed x tile
    in_specs += [pl.BlockSpec(w.shape, lambda i: (0, 0)) for w in padded_w]  # resident weights
    in_specs += [pl.BlockSpec(b_slab.shape, lambda i: (0, 0))]            # resident bias slab
    out_spec = pl.BlockSpec((TM, Cp), lambda i: (i, 0))                   # streamed out tile

    out_padded = pl.pallas_call(
        functools.partial(_mlp_kernel, tuple(out_dims)),
        out_shape=jax.ShapeDtypeStruct((Bp, Cp), jnp.float32),
        grid=grid,
        in_specs=in_specs,
        out_specs=out_spec,
        compiler_params=pltpu.CompilerParams(
            dimension_semantics=("parallel",),      # shard batch tiles across TCs on v7x
            vmem_limit_bytes=32 << 20,              # leave headroom on v7x's 64 MiB VMEM
        ),
    )(xp, *padded_w, b_slab)

    # Strip batch padding and the lane padding of the 10-wide classifier output.
    return out_padded[:B, :num_classes]


def init_mlp_params(key, input_size, width=128, num_classes=10):
    """Deterministic PyTorch-style init: U(-1/sqrt(fan_in), 1/sqrt(fan_in)).
    Weights are stored transposed (in, out) for the kernel."""
    sizes = [(input_size, width),
             (width, width),
             (width, width),
             (width, width),
             (width, width),
             (width, num_classes)]
    params = []
    for (fan_in, fan_out) in sizes:
        key, kw, kb = jax.random.split(key, 3)
        bound = 1.0 / jnp.sqrt(jnp.float32(fan_in))
        w_t = jax.random.uniform(kw, (fan_in, fan_out), jnp.float32, -bound, bound)
        b = jax.random.uniform(kb, (fan_out,), jnp.float32, -bound, bound)
        params.append((w_t, b))
    return params


def mlp_reference(x, params):
    h = x
    for (w_t, b) in params[:-1]:
        h = jnp.maximum(h @ w_t + b, 0.0)
    w_t, b = params[-1]
    return h @ w_t + b


if __name__ == "__main__":
    key = jax.random.PRNGKey(0)
    batch, input_size, width, num_classes = 8, 32, 128, 10

    key, kx = jax.random.split(key)
    x = jax.random.normal(kx, (batch, input_size), jnp.float32)
    params = init_mlp_params(key, input_size, width=width, num_classes=num_classes)

    out = mlp_forward(x, params)
    out = jax.block_until_ready(out)

    ref = mlp_reference(x, params)
    assert out.shape == (batch, num_classes)
    # bf16 matmul operands (f32 accumulation) -> looser tolerance than pure f32.
    assert jnp.allclose(out, ref, atol=5e-2, rtol=5e-2), "mismatch vs reference"

    print("KERNEL_OK")
</pallas_src>

<mosaic_0001>
module attributes {stable_mosaic.version = 11 : i64} {
  func.func @_mlp_kernel(%arg0: i32, %arg1: memref<8x128xbf16, #tpu.memory_space<vmem>>, %arg2: memref<128x128xbf16, #tpu.memory_space<vmem>>, %arg3: memref<128x128xbf16, #tpu.memory_space<vmem>>, %arg4: memref<128x128xbf16, #tpu.memory_space<vmem>>, %arg5: memref<128x128xbf16, #tpu.memory_space<vmem>>, %arg6: memref<128x128xbf16, #tpu.memory_space<vmem>>, %arg7: memref<128x128xbf16, #tpu.memory_space<vmem>>, %arg8: memref<6x128xf32, #tpu.memory_space<vmem>>, %arg9: memref<8x128xf32, #tpu.memory_space<vmem>>) attributes {dimension_semantics = [#tpu.dimension_semantics<parallel>], iteration_bounds = array<i64: 1>, scalar_prefetch = 0 : i64, scratch_operands = 0 : i64, tpu.core_type = #tpu.core_type<tc>, window_params = [{transform_indices = @transform_0, window_bounds = array<i64: 8, 128>}, {pipeline_mode = #tpu.pipeline_mode<synchronous>, transform_indices = @transform_1, window_bounds = array<i64: 128, 128>}, {pipeline_mode = #tpu.pipeline_mode<synchronous>, transform_indices = @transform_2, window_bounds = array<i64: 128, 128>}, {pipeline_mode = #tpu.pipeline_mode<synchronous>, transform_indices = @transform_3, window_bounds = array<i64: 128, 128>}, {pipeline_mode = #tpu.pipeline_mode<synchronous>, transform_indices = @transform_4, window_bounds = array<i64: 128, 128>}, {pipeline_mode = #tpu.pipeline_mode<synchronous>, transform_indices = @transform_5, window_bounds = array<i64: 128, 128>}, {pipeline_mode = #tpu.pipeline_mode<synchronous>, transform_indices = @transform_6, window_bounds = array<i64: 128, 128>}, {pipeline_mode = #tpu.pipeline_mode<synchronous>, transform_indices = @transform_7, window_bounds = array<i64: 6, 128>}, {transform_indices = @transform_8, window_bounds = array<i64: 8, 128>}]} {
    %c0 = arith.constant 0 : index
    %c0_0 = arith.constant 0 : index
    %0 = vector.load %arg8[%c0, %c0_0] : memref<6x128xf32, #tpu.memory_space<vmem>>, vector<6x128xf32>
    %c0_1 = arith.constant 0 : index
    %c0_2 = arith.constant 0 : index
    %1 = vector.load %arg1[%c0_1, %c0_2] : memref<8x128xbf16, #tpu.memory_space<vmem>>, vector<8x128xbf16>
    %c0_3 = arith.constant 0 : index
    %c0_4 = arith.constant 0 : index
    %2 = vector.load %arg2[%c0_3, %c0_4] : memref<128x128xbf16, #tpu.memory_space<vmem>>, vector<128x128xbf16>
    %cst = arith.constant dense<0.000000e+00> : vector<8x128xf32>
    %3 = tpu.matmul %1, %2, %cst {dimension_numbers = #tpu.dot_dimension_numbers<[1], [0], [0], [1], [0, 0, 1, 1], [], []>} : vector<8x128xbf16>, vector<128x128xbf16>, vector<8x128xf32> -> vector<8x128xf32>
    %4 = vector.extract_strided_slice %0 {offsets = [0, 0], sizes = [1, 128], strides = [1, 1]} : vector<6x128xf32> to vector<1x128xf32>
    %5 = vector.broadcast %4 : vector<1x128xf32> to vector<8x128xf32>
    %6 = arith.addf %3, %5 : vector<8x128xf32>
    %cst_5 = arith.constant 0.000000e+00 : f32
    %7 = vector.broadcast %cst_5 : f32 to vector<8x128xf32>
    %8 = arith.maximumf %6, %7 : vector<8x128xf32>
    %9 = arith.truncf %8 : vector<8x128xf32> to vector<8x128xbf16>
    %c0_6 = arith.constant 0 : index
    %c0_7 = arith.constant 0 : index
    %10 = vector.load %arg3[%c0_6, %c0_7] : memref<128x128xbf16, #tpu.memory_space<vmem>>, vector<128x128xbf16>
    %cst_8 = arith.constant dense<0.000000e+00> : vector<8x128xf32>
    %11 = tpu.matmul %9, %10, %cst_8 {dimension_numbers = #tpu.dot_dimension_numbers<[1], [0], [0], [1], [0, 0, 1, 1], [], []>} : vector<8x128xbf16>, vector<128x128xbf16>, vector<8x128xf32> -> vector<8x128xf32>
    %12 = vector.extract_strided_slice %0 {offsets = [1, 0], sizes = [1, 128], strides = [1, 1]} : vector<6x128xf32> to vector<1x128xf32>
    %13 = vector.broadcast %12 : vector<1x128xf32> to vector<8x128xf32>
    %14 = arith.addf %11, %13 : vector<8x128xf32>
    %cst_9 = arith.constant 0.000000e+00 : f32
    %15 = vector.broadcast %cst_9 : f32 to vector<8x128xf32>
    %16 = arith.maximumf %14, %15 : vector<8x128xf32>
    %17 = arith.truncf %16 : vector<8x128xf32> to vector<8x128xbf16>
    %c0_10 = arith.constant 0 : index
    %c0_11 = arith.constant 0 : index
    %18 = vector.load %arg4[%c0_10, %c0_11] : memref<128x128xbf16, #tpu.memory_space<vmem>>, vector<128x128xbf16>
    %cst_12 = arith.constant dense<0.000000e+00> : vector<8x128xf32>
    %19 = tpu.matmul %17, %18, %cst_12 {dimension_numbers = #tpu.dot_dimension_numbers<[1], [0], [0], [1], [0, 0, 1, 1], [], []>} : vector<8x128xbf16>, vector<128x128xbf16>, vector<8x128xf32> -> vector<8x128xf32>
    %20 = vector.extract_strided_slice %0 {offsets = [2, 0], sizes = [1, 128], strides = [1, 1]} : vector<6x128xf32> to vector<1x128xf32>
    %21 = vector.broadcast %20 : vector<1x128xf32> to vector<8x128xf32>
    %22 = arith.addf %19, %21 : vector<8x128xf32>
    %cst_13 = arith.constant 0.000000e+00 : f32
    %23 = vector.broadcast %cst_13 : f32 to vector<8x128xf32>
    %24 = arith.maximumf %22, %23 : vector<8x128xf32>
    %25 = arith.truncf %24 : vector<8x128xf32> to vector<8x128xbf16>
    %c0_14 = arith.constant 0 : index
    %c0_15 = arith.constant 0 : index
    %26 = vector.load %arg5[%c0_14, %c0_15] : memref<128x128xbf16, #tpu.memory_space<vmem>>, vector<128x128xbf16>
    %cst_16 = arith.constant dense<0.000000e+00> : vector<8x128xf32>
    %27 = tpu.matmul %25, %26, %cst_16 {dimension_numbers = #tpu.dot_dimension_numbers<[1], [0], [0], [1], [0, 0, 1, 1], [], []>} : vector<8x128xbf16>, vector<128x128xbf16>, vector<8x128xf32> -> vector<8x128xf32>
    %28 = vector.extract_strided_slice %0 {offsets = [3, 0], sizes = [1, 128], strides = [1, 1]} : vector<6x128xf32> to vector<1x128xf32>
    %29 = vector.broadcast %28 : vector<1x128xf32> to vector<8x128xf32>
    %30 = arith.addf %27, %29 : vector<8x128xf32>
    %cst_17 = arith.constant 0.000000e+00 : f32
    %31 = vector.broadcast %cst_17 : f32 to vector<8x128xf32>
    %32 = arith.maximumf %30, %31 : vector<8x128xf32>
    %33 = arith.truncf %32 : vector<8x128xf32> to vector<8x128xbf16>
    %c0_18 = arith.constant 0 : index
    %c0_19 = arith.constant 0 : index
    %34 = vector.load %arg6[%c0_18, %c0_19] : memref<128x128xbf16, #tpu.memory_space<vmem>>, vector<128x128xbf16>
    %cst_20 = arith.constant dense<0.000000e+00> : vector<8x128xf32>
    %35 = tpu.matmul %33, %34, %cst_20 {dimension_numbers = #tpu.dot_dimension_numbers<[1], [0], [0], [1], [0, 0, 1, 1], [], []>} : vector<8x128xbf16>, vector<128x128xbf16>, vector<8x128xf32> -> vector<8x128xf32>
    %36 = vector.extract_strided_slice %0 {offsets = [4, 0], sizes = [1, 128], strides = [1, 1]} : vector<6x128xf32> to vector<1x128xf32>
    %37 = vector.broadcast %36 : vector<1x128xf32> to vector<8x128xf32>
    %38 = arith.addf %35, %37 : vector<8x128xf32>
    %cst_21 = arith.constant 0.000000e+00 : f32
    %39 = vector.broadcast %cst_21 : f32 to vector<8x128xf32>
    %40 = arith.maximumf %38, %39 : vector<8x128xf32>
    %41 = arith.truncf %40 : vector<8x128xf32> to vector<8x128xbf16>
    %c0_22 = arith.constant 0 : index
    %c0_23 = arith.constant 0 : index
    %42 = vector.load %arg7[%c0_22, %c0_23] : memref<128x128xbf16, #tpu.memory_space<vmem>>, vector<128x128xbf16>
    %cst_24 = arith.constant dense<0.000000e+00> : vector<8x128xf32>
    %43 = tpu.matmul %41, %42, %cst_24 {dimension_numbers = #tpu.dot_dimension_numbers<[1], [0], [0], [1], [0, 0, 1, 1], [], []>} : vector<8x128xbf16>, vector<128x128xbf16>, vector<8x128xf32> -> vector<8x128xf32>
    %44 = vector.extract_strided_slice %0 {offsets = [5, 0], sizes = [1, 128], strides = [1, 1]} : vector<6x128xf32> to vector<1x128xf32>
    %45 = vector.broadcast %44 : vector<1x128xf32> to vector<8x128xf32>
    %46 = arith.addf %43, %45 : vector<8x128xf32>
    %c0_25 = arith.constant 0 : index
    %c0_26 = arith.constant 0 : index
    %47 = vector.load %arg9[%c0_25, %c0_26] : memref<8x128xf32, #tpu.memory_space<vmem>>, vector<8x128xf32>
    tpu.vector_store %arg9[%c0_25, %c0_26], %46 {strides = array<i32>} : memref<8x128xf32, #tpu.memory_space<vmem>>, vector<8x128xf32>,
    return
  }
  func.func @transform_0(%arg0: i32) -> (i32, i32) {
    %c0_i32 = arith.constant 0 : i32
    %c0_i32_0 = arith.constant 0 : i32
    return %arg0, %c0_i32 : i32, i32
  }
  func.func @transform_1(%arg0: i32) -> (i32, i32) {
    %c0_i32 = arith.constant 0 : i32
    %c0_i32_0 = arith.constant 0 : i32
    %c0_i32_1 = arith.constant 0 : i32
    return %c0_i32, %c0_i32_0 : i32, i32
  }
  func.func @transform_2(%arg0: i32) -> (i32, i32) {
    %c0_i32 = arith.constant 0 : i32
    %c0_i32_0 = arith.constant 0 : i32
    %c0_i32_1 = arith.constant 0 : i32
    return %c0_i32, %c0_i32_0 : i32, i32
  }
  func.func @transform_3(%arg0: i32) -> (i32, i32) {
    %c0_i32 = arith.constant 0 : i32
    %c0_i32_0 = arith.constant 0 : i32
    %c0_i32_1 = arith.constant 0 : i32
    return %c0_i32, %c0_i32_0 : i32, i32
  }
  func.func @transform_4(%arg0: i32) -> (i32, i32) {
    %c0_i32 = arith.constant 0 : i32
    %c0_i32_0 = arith.constant 0 : i32
    %c0_i32_1 = arith.constant 0 : i32
    return %c0_i32, %c0_i32_0 : i32, i32
  }
  func.func @transform_5(%arg0: i32) -> (i32, i32) {
    %c0_i32 = arith.constant 0 : i32
    %c0_i32_0 = arith.constant 0 : i32
    %c0_i32_1 = arith.constant 0 : i32
    return %c0_i32, %c0_i32_0 : i32, i32
  }
  func.func @transform_6(%arg0: i32) -> (i32, i32) {
    %c0_i32 = arith.constant 0 : i32
    %c0_i32_0 = arith.constant 0 : i32
    %c0_i32_1 = arith.constant 0 : i32
    return %c0_i32, %c0_i32_0 : i32, i32
  }
  func.func @transform_7(%arg0: i32) -> (i32, i32) {
    %c0_i32 = arith.constant 0 : i32
    %c0_i32_0 = arith.constant 0 : i32
    %c0_i32_1 = arith.constant 0 : i32
    return %c0_i32, %c0_i32_0 : i32, i32
  }
  func.func @transform_8(%arg0: i32) -> (i32, i32) {
    %c0_i32 = arith.constant 0 : i32
    %c0_i32_0 = arith.constant 0 : i32
    return %arg0, %c0_i32 : i32, i32
  }
}

</mosaic_0001>

<bundles_post_ra>
// kernel: tpu_custom_call.1
= control target key start
LH: loop header
LB: loop body
LE: loop exit
PB: predicated region body
PF: predicated region fallthrough
CT: control target
= control target key end

     0   :  { %13 = vsyncpa [#allocation3], 0  ;;  %s1433_s0 = inlined_call_operand.hbm [shape: bf16[8,128], index: 0, kind: input, shape index: {}]   ;;  %s1434_s1 = inlined_call_operand.hbm [shape: bf16[128,128], index: 1, kind: input, shape index: {}]   ;;  %s1435_s2 = inlined_call_operand.hbm [shape: bf16[128,128], index: 2, kind: input, shape index: {}]   ;;  %s1436_s3 = inlined_call_operand.hbm [shape: bf16[128,128], index: 3, kind: input, shape index: {}]   ;;  %s1437_s4 = inlined_call_operand.hbm [shape: bf16[128,128], index: 4, kind: input, shape index: {}]   ;;  %s1438_s5 = inlined_call_operand.hbm [shape: bf16[128,128], index: 5, kind: input, shape index: {}]   ;;  %s1439_s6 = inlined_call_operand.hbm [shape: bf16[128,128], index: 6, kind: input, shape index: {}]   ;;  %s1440_s7 = inlined_call_operand.vmem [shape: f32[6,128], index: 7, kind: input, shape index: {}]   ;;  %s1441_s8 = inlined_call_operand.hbm [shape: f32[8,128], index: 8, kind: output, shape index: {}]  }
   0x1   :  { %14 = vsyncpa [#allocation6], 0 }
   0x2   :  { %15 = vsyncpa [#allocation9], 0 }
   0x3   :  { %16 = vsyncpa [#allocation12], 0 }
   0x4   :  { %17 = vsyncpa [#allocation4], 0  ;;  %s1255_s27 = smov [#allocation5]  }
   0x5   :  { %s33_s28 = sshll.u32 %s1255_s27, 4  ;;  %s34_s28 = int_to_ptr.vmem [resolvable:$true] %s33_s28 }
   0x6   :  { %s1093_s29 = scalar_lea.vmem %s34_s28, 1024  ;;  %p1098_p1 = scmp.lt.s32.totalorder %s34_s28, %s34_s28 }
   0x7   :  { %p1094_p0 = scmp.ne.s32.totalorder %s34_s28, %s1093_s29  ;;  %p1099_p2 = scmp.lt.s32.totalorder %s1093_s29, %s1093_s29 }
   0x9   :  { %p1100_p3 = por %p1099_p2, %p1098_p1 }
   0xb   :  { %p1101_p4 = pnand %p1100_p3, %p1094_p0 }
   0xd   :  { %1104 = shalt.err (!%p1101_p4)
}
   0xe   :  { %s1256_s30 = smov 64   ;;  %s1257_s9 = smov 4  }
   0xf   :  { %39 = dma.hbm_to_vmem [thread:$0]  %s1434_s1, 1024, %s34_s28, [#allocation6], %s1256_s30, %s1256_s30, %s1257_s9  }
  0x10   :  { %s1258_s12 = smov [#allocation8]   ;;  %s1259_s14 = smov [#allocation11]  }
  0x11   :  { %s57_s13 = sshll.u32 %s1258_s12, 4  ;;  %s81_s15 = sshll.u32 %s1259_s14, 4  ;;  %s58_s13 = int_to_ptr.vmem [resolvable:$true] %s57_s13  ;;  %s82_s15 = int_to_ptr.vmem [resolvable:$true] %s81_s15 }
  0x12   :  { %s1113_s16 = scalar_lea.vmem %s58_s13, 1024  ;;  %p1118_p6 = scmp.lt.s32.totalorder %s58_s13, %s58_s13 }
  0x13   :  { %p1114_p5 = scmp.ne.s32.totalorder %s58_s13, %s1113_s16  ;;  %p1119_p7 = scmp.lt.s32.totalorder %s1113_s16, %s1113_s16 }
  0x15   :  { %p1120_p8 = por %p1119_p7, %p1118_p6 }
  0x17   :  { %p1121_p9 = pnand %p1120_p8, %p1114_p5 }
  0x19   :  { %1124 = shalt.err (!%p1121_p9)
}
  0x1a   :  { %63 = dma.hbm_to_vmem [thread:$0]  %s1436_s3, 1024, %s58_s13, [#allocation9], %s1256_s30, %s1256_s30, %s1257_s9  }
  0x1b   :  { %s1133_s1 = scalar_lea.vmem %s82_s15, 1024  ;;  %p1138_p11 = scmp.lt.s32.totalorder %s82_s15, %s82_s15 }
  0x1c   :  { %p1134_p10 = scmp.ne.s32.totalorder %s82_s15, %s1133_s1  ;;  %p1139_p12 = scmp.lt.s32.totalorder %s1133_s1, %s1133_s1 }
  0x1e   :  { %p1140_p13 = por %p1139_p12, %p1138_p11 }
  0x20   :  { %p1141_p0 = pnand %p1140_p13, %p1134_p10 }
  0x22   :  { %1144 = shalt.err (!%p1141_p0)
}
  0x23   :  { %87 = dma.hbm_to_vmem [thread:$0]  %s1438_s5, 1024, %s82_s15, [#allocation12], %s1256_s30, %s1256_s30, %s1257_s9  }
  0x24   :  { %s1260_s21 = smov [#allocation2]   ;;  %s1261_s23 = smov [#allocation7]  }
  0x25   :  { %s24_s22 = sshll.u32 %s1260_s21, 4  ;;  %s45_s3 = sshll.u32 %s1261_s23, 4  ;;  %s25_s22 = int_to_ptr.vmem [resolvable:$true] %s24_s22  ;;  %s46_s3 = int_to_ptr.vmem [resolvable:$true] %s45_s3 }
  0x26   :  { %s1153_s24 = scalar_lea.vmem %s25_s22, 64  ;;  %p1158_p2 = scmp.lt.s32.totalorder %s25_s22, %s25_s22 }
  0x27   :  { %p1154_p1 = scmp.ne.s32.totalorder %s25_s22, %s1153_s24  ;;  %p1159_p3 = scmp.lt.s32.totalorder %s1153_s24, %s1153_s24 }
  0x29   :  { %p1160_p4 = por %p1159_p3, %p1158_p2 }
  0x2b   :  { %p1161_p5 = pnand %p1160_p4, %p1154_p1 }
  0x2d   :  { %1164 = shalt.err (!%p1161_p5)
}
  0x2e   :  { %27 = dma.hbm_to_vmem [thread:$0]  %s1433_s0, 64, %s25_s22, [#allocation3]  }
  0x2f   :  { %s1173_s27 = scalar_lea.vmem %s46_s3, 1024  ;;  %p1178_p7 = scmp.lt.s32.totalorder %s46_s3, %s46_s3 }
  0x30   :  { %p1174_p6 = scmp.ne.s32.totalorder %s46_s3, %s1173_s27  ;;  %p1179_p8 = scmp.lt.s32.totalorder %s1173_s27, %s1173_s27 }
  0x32   :  { %p1180_p9 = por %p1179_p8, %p1178_p7 }
  0x34   :  { %p1181_p10 = pnand %p1180_p9, %p1174_p6 }
  0x36   :  { %1184 = shalt.err (!%p1181_p10)
}
  0x37   :  { %51 = dma.hbm_to_vmem [thread:$0]  %s1435_s2, 1024, %s46_s3, [#allocation6], %s1256_s30, %s1256_s30, %s1257_s9  }
  0x38   :  { %s1262_s29 = smov [#allocation10]   ;;  %s1263_s11 = smov [#allocation13]  }
  0x39   :  { %s69_s10 = sshll.u32 %s1262_s29, 4  ;;  %s93_s0 = sshll.u32 %s1263_s11, 4  ;;  %s70_s10 = int_to_ptr.vmem [resolvable:$true] %s69_s10  ;;  %s94_s0 = int_to_ptr.vmem [resolvable:$true] %s93_s0 }
  0x3a   :  { %s1193_s12 = scalar_lea.vmem %s70_s10, 1024  ;;  %p1198_p12 = scmp.lt.s32.totalorder %s70_s10, %s70_s10 }
  0x3b   :  { %p1194_p11 = scmp.ne.s32.totalorder %s70_s10, %s1193_s12  ;;  %p1199_p13 = scmp.lt.s32.totalorder %s1193_s12, %s1193_s12 }
  0x3d   :  { %p1200_p0 = por %p1199_p13, %p1198_p12 }
  0x3f   :  { %p1201_p1 = pnand %p1200_p0, %p1194_p11 }
  0x41   :  { %1204 = shalt.err (!%p1201_p1)
}
  0x42   :  { %75 = dma.hbm_to_vmem [thread:$0]  %s1437_s4, 1024, %s70_s10, [#allocation9], %s1256_s30, %s1256_s30, %s1257_s9  }
  0x43   :  { %s1213_s2 = scalar_lea.vmem %s94_s0, 1024  ;;  %p1218_p3 = scmp.lt.s32.totalorder %s94_s0, %s94_s0 }
  0x44   :  { %p1214_p2 = scmp.ne.s32.totalorder %s94_s0, %s1213_s2  ;;  %p1219_p4 = scmp.lt.s32.totalorder %s1213_s2, %s1213_s2 }
  0x46   :  { %p1220_p5 = por %p1219_p4, %p1218_p3 }
  0x48   :  { %p1221_p6 = pnand %p1220_p5, %p1214_p2 }
  0x4a   :  { %1224 = shalt.err (!%p1221_p6)
}
  0x4b   :  { %99 = dma.hbm_to_vmem [thread:$0]  %s1439_s6, 1024, %s94_s0, [#allocation12], %s1256_s30, %s1256_s30, %s1257_s9  }
  0x4c   :  { %1245 = dma.done.wait [#allocation3], 64  }
  0x4d   :  { %1246 = vsyncadd [#allocation3], 4294967232 }
  0x4e   :  { %1247 = dma.done.wait [#allocation6], 2048  }
  0x4f   :  { %1248 = vsyncadd [#allocation6], 4294965248 }
  0x50   :  { %1249 = dma.done.wait [#allocation9], 2048  }
  0x51   :  { %1250 = vsyncadd [#allocation9], 4294965248 }
  0x52   :  { %1251 = dma.done.wait [#allocation12], 2048  }
  0x53   :  { %1252 = vsyncadd [#allocation12], 4294965248  ;;  %v1264_v0 = vmov 0.0   ;;  %vm1265_vm0 = vmmov 0   ;;  %v1037_v1 = vld [vmem:[#allocation5 + $0x38] sm:$0xff]   ;;  %v1038_v2 = vld [vmem:[#allocation5 + $0x30] sm:$0xff]   ;;  %v142_v24 = vlaneseq }
  0x54   :  { %905 = vmatprep.subr.bf16.mxu0 %v1264_v0  ;;  %921 = vmatprep.mubr.msk.bf16.mxu0 %vm1265_vm0, %v1264_v0  ;;  %v1039_v3 = vld [vmem:[#allocation5 + $0x28] sm:$0xff]   ;;  %v1045_v4 = vld [vmem:[#allocation7 + $0x38] sm:$0xff]   ;;  %v1040_v5 = vld [vmem:[#allocation5 + $0x20] sm:$0xff]  }
  0x55   :  { %925 = vmatprep.subr.bf16.mxu1 %v1264_v0  ;;  %941 = vmatprep.mubr.msk.bf16.mxu1 %vm1265_vm0, %v1264_v0  ;;  %v1046_v6 = vld [vmem:[#allocation7 + $0x30] sm:$0xff]   ;;  %v1041_v7 = vld [vmem:[#allocation5 + $0x18] sm:$0xff]   ;;  %v1047_v8 = vld [vmem:[#allocation7 + $0x28] sm:$0xff]   ;;  %v1381_v25 = vshrl.u32 %v142_v24, 7 }
  0x56   :  { %906 = vmatpush3.bf16.msra.mxu0 %v1037_v1  ;;  %926 = vmatpush3.bf16.msra.mxu1 %v1045_v4  ;;  %v1042_v9 = vld [vmem:[#allocation5 + $0x10] sm:$0xff]   ;;  %v1048_v10 = vld [vmem:[#allocation7 + $0x20] sm:$0xff]   ;;  %v1043_v11 = vld [vmem:[#allocation5 + $0x8] sm:$0xff]  }
  0x57   :  { %907 = vmatprep.subr.bf16.mxu0 %v1264_v0  ;;  %927 = vmatprep.subr.bf16.mxu1 %v1264_v0  ;;  %v1049_v12 = vld [vmem:[#allocation7 + $0x18] sm:$0xff]   ;;  %v1044_v13 = vld [vmem:[#allocation5] sm:$0xff]   ;;  %v1050_v14 = vld [vmem:[#allocation7 + $0x10] sm:$0xff]   ;;  %v144_v26 = vsub.s32 0, %v1381_v25  ;;  %v254_v44 = vsub.s32 1, %v1381_v25  ;;  %v364_v61 = vsub.s32 2, %v1381_v25 }
  0x58   :  { %v125_v15 = vld [vmem:[#allocation2] sm:$0xf]  ;;  %v1051_v16 = vld [vmem:[#allocation7 + $0x8] sm:$0xff]   ;;  %v1052_v17 = vld [vmem:[#allocation7] sm:$0xff]  }
  0x59   :  { %v1053_v18 = vld [vmem:[#allocation8 + $0x38] sm:$0xff]   ;;  %v1054_v19 = vld [vmem:[#allocation8 + $0x30] sm:$0xff]   ;;  %v1055_v20 = vld [vmem:[#allocation8 + $0x28] sm:$0xff]  }
  0x5a   :  { %908 = vmatpush3.bf16.msra.mxu0 %v1038_v2  ;;  %928 = vmatpush3.bf16.msra.mxu1 %v1046_v6  ;;  %v1056_v21 = vld [vmem:[#allocation8 + $0x20] sm:$0xff]   ;;  %v1057_v22 = vld [vmem:[#allocation8 + $0x18] sm:$0xff]   ;;  %v1058_v23 = vld [vmem:[#allocation8 + $0x10] sm:$0xff]  }
  0x5b   :  { %909 = vmatprep.subr.bf16.mxu0 %v1264_v0  ;;  %929 = vmatprep.subr.bf16.mxu1 %v1264_v0  ;;  %v1387_v27 = vld [vmem:[%s1440_s7] sm:$0x3f]  ;;  %v1059_v36 = vld [vmem:[#allocation8 + $0x8] sm:$0xff]   ;;  %v1060_v37 = vld [vmem:[#allocation8] sm:$0xff]   ;;  %s1266_s7 = smov [#allocation14]  }
  0x5c   :  { %v145_v28 = vrot.slane %v1387_v27, %v144_v26  ;;  %v1061_v38 = vld [vmem:[#allocation10 + $0x38] sm:$0xff]   ;;  %v1062_v39 = vld [vmem:[#allocation10 + $0x30] sm:$0xff]   ;;  %v1063_v40 = vld [vmem:[#allocation10 + $0x28] sm:$0xff]   ;;  %v255_v45 = vrot.slane %v1387_v27, %v254_v44  ;;  %v365_v62 = vrot.slane %v1387_v27, %v364_v61  ;;  %s791_s30 = sshll.u32 %s1266_s7, 4  ;;  %s792_s30 = int_to_ptr.vmem [resolvable:$true] %s791_s30 }
  0x5d   :  { %v1064_v41 = vld [vmem:[#allocation10 + $0x20] sm:$0xff]   ;;  %v1065_v42 = vld [vmem:[#allocation10 + $0x18] sm:$0xff]   ;;  %v1066_v43 = vld [vmem:[#allocation10 + $0x10] sm:$0xff]   ;;  %s1225_s9 = scalar_lea.vmem %s792_s30, 128  ;;  %p1230_p8 = scmp.lt.s32.totalorder %s792_s30, %s792_s30 }
  0x5e   :  { %910 = vmatpush3.bf16.msra.mxu0 %v1039_v3  ;;  %930 = vmatpush3.bf16.msra.mxu1 %v1047_v8  ;;  %v1067_v53 = vld [vmem:[#allocation10 + $0x8] sm:$0xff]   ;;  %v1068_v54 = vld [vmem:[#allocation10] sm:$0xff]   ;;  %v1069_v55 = vld [vmem:[#allocation11 + $0x38] sm:$0xff]   ;;  %p1226_p7 = scmp.ne.s32.totalorder %s792_s30, %s1225_s9  ;;  %p1231_p9 = scmp.lt.s32.totalorder %s1225_s9, %s1225_s9 }
  0x5f   :  { %911 = vmatprep.subr.bf16.mxu0 %v1264_v0  ;;  %931 = vmatprep.subr.bf16.mxu1 %v1264_v0  ;;  %v1070_v56 = vld [vmem:[#allocation11 + $0x30] sm:$0xff]   ;;  %v1071_v57 = vld [vmem:[#allocation11 + $0x28] sm:$0xff]   ;;  %v1072_v58 = vld [vmem:[#allocation11 + $0x20] sm:$0xff]  }
  0x60   :  { %v1073_v59 = vld [vmem:[#allocation11 + $0x18] sm:$0xff]   ;;  %v1074_v60 = vld [vmem:[#allocation11 + $0x10] sm:$0xff]   ;;  %v1076_v8 = vld [vmem:[#allocation11] sm:$0xff]   ;;  %p1232_p10 = por %p1231_p9, %p1230_p8 }
  0x61   :  { %v1083_v24 = vld [vmem:[#allocation13 + $0x8] sm:$0xff]   ;;  %v1084_v26 = vld [vmem:[#allocation13] sm:$0xff]  }
  0x62   :  { %912 = vmatpush3.bf16.msra.mxu0 %v1040_v5  ;;  %932 = vmatpush3.bf16.msra.mxu1 %v1048_v10  ;;  %v1078_v10 = vld [vmem:[#allocation13 + $0x30] sm:$0xff]   ;;  %p1233_p11 = pnand %p1232_p10, %p1226_p7 }
  0x63   :  { %913 = vmatprep.subr.bf16.mxu0 %v1264_v0  ;;  %933 = vmatprep.subr.bf16.mxu1 %v1264_v0 }
  0x66   :  { %914 = vmatpush3.bf16.msra.mxu0 %v1041_v7  ;;  %934 = vmatpush3.bf16.msra.mxu1 %v1049_v12  ;;  %v1075_v7 = vld [vmem:[#allocation11 + $0x8] sm:$0xff]   ;;  %v1080_v12 = vld [vmem:[#allocation13 + $0x20] sm:$0xff]  }
  0x67   :  { %915 = vmatprep.subr.bf16.mxu0 %v1264_v0  ;;  %935 = vmatprep.subr.bf16.mxu1 %v1264_v0 }
  0x6a   :  { %916 = vmatpush3.bf16.msra.mxu0 %v1042_v9  ;;  %936 = vmatpush3.bf16.msra.mxu1 %v1050_v14  ;;  %v1077_v9 = vld [vmem:[#allocation13 + $0x38] sm:$0xff]   ;;  %v1082_v14 = vld [vmem:[#allocation13 + $0x10] sm:$0xff]  }
  0x6b   :  { %917 = vmatprep.subr.bf16.mxu0 %v1264_v0  ;;  %937 = vmatprep.subr.bf16.mxu1 %v1264_v0 }
  0x6e   :  { %918 = vmatpush3.bf16.msra.mxu0 %v1043_v11  ;;  %938 = vmatpush3.bf16.msra.mxu1 %v1051_v16  ;;  %v1079_v11 = vld [vmem:[#allocation13 + $0x28] sm:$0xff]  }
  0x6f   :  { %919 = vmatprep.subr.bf16.mxu0 %v1264_v0  ;;  %939 = vmatprep.subr.bf16.mxu1 %v1264_v0 }
  0x72   :  { %920 = vmatpush3.bf16.msra.mxu0 %v1044_v13  ;;  %940 = vmatpush3.bf16.msra.mxu1 %v1052_v17  ;;  %v1081_v13 = vld [vmem:[#allocation13 + $0x18] sm:$0xff]  }
  0x73   :  { %945 = vmatprep.subr.bf16.mxu0 %v1264_v0  ;;  %965 = vmatprep.subr.bf16.mxu1 %v1264_v0 }
  0x75   :  { %922 = vmatmul.mubr.bf16.vlgmr.msra.gmra.mxu0 %v125_v15  ;;  %v474_v15 = vsub.s32 3, %v1381_v25 }
  0x76   :  { %961 = vmatprep.mubr.msk.bf16.mxu0 %vm1265_vm0, %v1264_v0  ;;  %946 = vmatpush3.bf16.msra.mxu0 %v1053_v18 }
  0x77   :  { %947 = vmatprep.subr.bf16.mxu0 %v1264_v0  ;;  %v475_v16 = vrot.slane %v1387_v27, %v474_v15 }
  0x7a   :  { %948 = vmatpush3.bf16.msra.mxu0 %v1054_v19 }
  0x7b   :  { %949 = vmatprep.subr.bf16.mxu0 %v1264_v0 }
  0x7e   :  { %950 = vmatpush3.bf16.msra.mxu0 %v1055_v20 }
  0x7f   :  { %951 = vmatprep.subr.bf16.mxu0 %v1264_v0 }
  0x82   :  { %952 = vmatpush3.bf16.msra.mxu0 %v1056_v21 }
  0x83   :  { %953 = vmatprep.subr.bf16.mxu0 %v1264_v0 }
  0x86   :  { %954 = vmatpush3.bf16.msra.mxu0 %v1057_v22 }
  0x87   :  { %955 = vmatprep.subr.bf16.mxu0 %v1264_v0 }
  0x8a   :  { %956 = vmatpush3.bf16.msra.mxu0 %v1058_v23 }
  0x8b   :  { %957 = vmatprep.subr.bf16.mxu0 %v1264_v0 }
  0x8e   :  { %958 = vmatpush3.bf16.msra.mxu0 %v1059_v36 }
  0x8f   :  { %959 = vmatprep.subr.bf16.mxu0 %v1264_v0 }
  0x92   :  { %960 = vmatpush3.bf16.msra.mxu0 %v1060_v37  ;;  %v694_v37 = vsub.s32 5, %v1381_v25 }
  0x93   :  { %985 = vmatprep.subr.bf16.mxu0 %v1264_v0 }
 0x135   :  { %v228_v29 = vpop.f32.mrf.mxu0 }
 0x136   :  { %v229_v30 = vadd.f32 %v228_v29, %v145_v28  ;;  %v584_v28 = vsub.s32 4, %v1381_v25 }
 0x137   :  { %v923_v31 = vpop.f32.mrf.mxu0 }
 0x138   :  { %v234_v32 = vmax.f32 %v229_v30, 0.0  ;;  %v585_v29 = vrot.slane %v1387_v27, %v584_v28 }
 0x139   :  { %v231_v33 = vpop.f32.mrf.mxu0 }
 0x13a   :  { %v235_v34 = vpack.c.bf16 %v234_v32, %v234_v32 }
 0x13b   :  { %v924_v35 = vpop.f32.mrf.mxu0 }
 0x13c   :  { %942 = vmatmul.mubr.bf16.vlgmr.msra.gmra.mxu1 %v235_v34 }
 0x13d   :  { %981 = vmatprep.mubr.msk.bf16.mxu1 %vm1265_vm0, %v1264_v0  ;;  %966 = vmatpush3.bf16.msra.mxu1 %v1061_v38  ;;  %v695_v38 = vrot.slane %v1387_v27, %v694_v37 }
 0x13e   :  { %967 = vmatprep.subr.bf16.mxu1 %v1264_v0 }
 0x141   :  { %968 = vmatpush3.bf16.msra.mxu1 %v1062_v39 }
 0x142   :  { %969 = vmatprep.subr.bf16.mxu1 %v1264_v0 }
 0x145   :  { %970 = vmatpush3.bf16.msra.mxu1 %v1063_v40 }
 0x146   :  { %971 = vmatprep.subr.bf16.mxu1 %v1264_v0 }
 0x149   :  { %972 = vmatpush3.bf16.msra.mxu1 %v1064_v41 }
 0x14a   :  { %973 = vmatprep.subr.bf16.mxu1 %v1264_v0 }
 0x14d   :  { %974 = vmatpush3.bf16.msra.mxu1 %v1065_v42 }
 0x14e   :  { %975 = vmatprep.subr.bf16.mxu1 %v1264_v0 }
 0x151   :  { %976 = vmatpush3.bf16.msra.mxu1 %v1066_v43 }
 0x152   :  { %977 = vmatprep.subr.bf16.mxu1 %v1264_v0 }
 0x155   :  { %978 = vmatpush3.bf16.msra.mxu1 %v1067_v53 }
 0x156   :  { %979 = vmatprep.subr.bf16.mxu1 %v1264_v0 }
 0x159   :  { %980 = vmatpush3.bf16.msra.mxu1 %v1068_v54 }
 0x15a   :  { %1005 = vmatprep.subr.bf16.mxu1 %v1264_v0 }
 0x1fc   :  { %v338_v46 = vpop.f32.mrf.mxu1 }
 0x1fd   :  { %v339_v47 = vadd.f32 %v338_v46, %v255_v45 }
 0x1fe   :  { %v943_v48 = vpop.f32.mrf.mxu1 }
 0x1ff   :  { %v344_v49 = vmax.f32 %v339_v47, 0.0 }
 0x200   :  { %v341_v50 = vpop.f32.mrf.mxu1 }
 0x201   :  { %v345_v51 = vpack.c.bf16 %v344_v49, %v344_v49 }
 0x202   :  { %v944_v52 = vpop.f32.mrf.mxu1 }
 0x203   :  { %962 = vmatmul.mubr.bf16.vlgmr.msra.gmra.mxu0 %v345_v51 }
 0x204   :  { %1001 = vmatprep.mubr.msk.bf16.mxu0 %vm1265_vm0, %v1264_v0  ;;  %986 = vmatpush3.bf16.msra.mxu0 %v1069_v55 }
 0x205   :  { %987 = vmatprep.subr.bf16.mxu0 %v1264_v0 }
 0x208   :  { %988 = vmatpush3.bf16.msra.mxu0 %v1070_v56 }
 0x209   :  { %989 = vmatprep.subr.bf16.mxu0 %v1264_v0 }
 0x20c   :  { %990 = vmatpush3.bf16.msra.mxu0 %v1071_v57 }
 0x20d   :  { %991 = vmatprep.subr.bf16.mxu0 %v1264_v0 }
 0x210   :  { %992 = vmatpush3.bf16.msra.mxu0 %v1072_v58 }
 0x211   :  { %993 = vmatprep.subr.bf16.mxu0 %v1264_v0 }
 0x214   :  { %994 = vmatpush3.bf16.msra.mxu0 %v1073_v59 }
 0x215   :  { %995 = vmatprep.subr.bf16.mxu0 %v1264_v0 }
 0x218   :  { %996 = vmatpush3.bf16.msra.mxu0 %v1074_v60 }
 0x219   :  { %997 = vmatprep.subr.bf16.mxu0 %v1264_v0 }
 0x21c   :  { %998 = vmatpush3.bf16.msra.mxu0 %v1075_v7 }
 0x21d   :  { %999 = vmatprep.subr.bf16.mxu0 %v1264_v0 }
 0x220   :  { %1000 = vmatpush3.bf16.msra.mxu0 %v1076_v8 }
 0x2c3   :  { %v448_v63 = vpop.f32.mrf.mxu0 }
 0x2c4   :  { %v449_v1 = vadd.f32 %v448_v63, %v365_v62 }
 0x2c5   :  { %v963_v2 = vpop.f32.mrf.mxu0 }
 0x2c6   :  { %v454_v3 = vmax.f32 %v449_v1, 0.0 }
 0x2c7   :  { %v451_v4 = vpop.f32.mrf.mxu0 }
 0x2c8   :  { %v455_v5 = vpack.c.bf16 %v454_v3, %v454_v3 }
 0x2c9   :  { %v964_v6 = vpop.f32.mrf.mxu0 }
 0x2ca   :  { %982 = vmatmul.mubr.bf16.vlgmr.msra.gmra.mxu1 %v455_v5 }
 0x2cb   :  { %1021 = vmatprep.mubr.msk.bf16.mxu1 %vm1265_vm0, %v1264_v0  ;;  %1006 = vmatpush3.bf16.msra.mxu1 %v1077_v9 }
 0x2cc   :  { %1007 = vmatprep.subr.bf16.mxu1 %v1264_v0 }
 0x2cf   :  { %1008 = vmatpush3.bf16.msra.mxu1 %v1078_v10 }
 0x2d0   :  { %1009 = vmatprep.subr.bf16.mxu1 %v1264_v0 }
 0x2d3   :  { %1010 = vmatpush3.bf16.msra.mxu1 %v1079_v11 }
 0x2d4   :  { %1011 = vmatprep.subr.bf16.mxu1 %v1264_v0 }
 0x2d7   :  { %1012 = vmatpush3.bf16.msra.mxu1 %v1080_v12 }
 0x2d8   :  { %1013 = vmatprep.subr.bf16.mxu1 %v1264_v0 }
 0x2db   :  { %1014 = vmatpush3.bf16.msra.mxu1 %v1081_v13 }
 0x2dc   :  { %1015 = vmatprep.subr.bf16.mxu1 %v1264_v0 }
 0x2df   :  { %1016 = vmatpush3.bf16.msra.mxu1 %v1082_v14 }
 0x2e0   :  { %1017 = vmatprep.subr.bf16.mxu1 %v1264_v0 }
 0x2e3   :  { %1018 = vmatpush3.bf16.msra.mxu1 %v1083_v24 }
 0x2e4   :  { %1019 = vmatprep.subr.bf16.mxu1 %v1264_v0 }
 0x2e7   :  { %1020 = vmatpush3.bf16.msra.mxu1 %v1084_v26 }
 0x38a   :  { %v558_v17 = vpop.f32.mrf.mxu1 }
 0x38b   :  { %v559_v18 = vadd.f32 %v558_v17, %v475_v16 }
 0x38c   :  { %v983_v19 = vpop.f32.mrf.mxu1 }
 0x38d   :  { %v564_v20 = vmax.f32 %v559_v18, 0.0 }
 0x38e   :  { %v561_v21 = vpop.f32.mrf.mxu1 }
 0x38f   :  { %v565_v22 = vpack.c.bf16 %v564_v20, %v564_v20 }
 0x390   :  { %v984_v23 = vpop.f32.mrf.mxu1 }
 0x391   :  { %1002 = vmatmul.mubr.bf16.vlgmr.msra.gmra.mxu0 %v565_v22 }
 0x451   :  { %v668_v30 = vpop.f32.mrf.mxu0 }
 0x452   :  { %v669_v31 = vadd.f32 %v668_v30, %v585_v29 }
 0x453   :  { %v1003_v32 = vpop.f32.mrf.mxu0 }
 0x454   :  { %v674_v33 = vmax.f32 %v669_v31, 0.0 }
 0x455   :  { %v671_v34 = vpop.f32.mrf.mxu0 }
 0x456   :  { %v675_v35 = vpack.c.bf16 %v674_v33, %v674_v33 }
 0x457   :  { %v1004_v36 = vpop.f32.mrf.mxu0 }
 0x458   :  { %1022 = vmatmul.mubr.bf16.vlgmr.msra.gmra.mxu1 %v675_v35 }
 0x518   :  { %v778_v0 = vpop.f32.mrf.mxu1 }
 0x519   :  { %v779_v39 = vadd.f32 %v778_v0, %v695_v38 }
 0x51a   :  { %v1023_v40 = vpop.f32.mrf.mxu1 }
 0x51b   :  { %784 = vst [vmem:[#allocation14] sm:$0xff] %v779_v39 }
 0x51c   :  { %v781_v41 = vpop.f32.mrf.mxu1 }
 0x51d   :  { %1236 = shalt.err (!%p1233_p11)
}
 0x51e   :  { %794 = dma.vmem_to_hbm [thread:$0]  %s792_s30, 128, %s1441_s8, [#allocation4]   ;;  %v1024_v25 = vpop.f32.mrf.mxu1 }
 0x51f   :  { %1253 = dma.done.wait [#allocation4], 128  }
 0x520   :  { %1254 = vsyncadd [#allocation4], 4294967168 }
 0x521   :  { %798 = vsyncpa [#allocation3], 1 }
 0x522   :  { %799 = vsyncpa [#allocation6], 1 }
 0x523   :  { %800 = vsyncpa [#allocation9], 1 }
 0x524   :  { %801 = vsyncpa [#allocation12], 1 }
 0x525   :  { %802 = vsyncpa [#allocation4], 1 }

</bundles_post_ra>
